<compile_context>
chip_gen: v5e
topology: v5e:2x2
jax: 0.10.0
libtpu: 0.0.40
codegen_flags: <defaults>
</compile_context>

<pallas_src>
import functools

import jax
import jax.numpy as jnp
from jax.experimental import pallas as pl
from jax.experimental.pallas import tpu as pltpu


# MXU operand dtype (accumulation is always f32 via preferred_element_type).
# Set to jnp.float32 if bit-exact f32 parity with a pure-f32 reference is needed.
_MXU_DTYPE = jnp.bfloat16

_V_CHUNK_TARGET = 1024      # streamed vocab rows per grid step (lane-aligned)
_NUM_CORES = 2              # v7x has 2 TCs; harmless on 1-TC v5e / v6e
_TOKENS_PER_STEP = 32       # gather tile: rows (tokens) per grid step
_NEG = float(jnp.finfo(jnp.float32).min)   # finite "-inf" (keeps online LSE NaN-free)


def _cdiv(a, b):
    return -(-a // b)


def _round_up(x, m):
    return _cdiv(x, m) * m


def _vmem_limit_bytes():
    """<=48 MiB on v7x (64 MiB physical), 64 MiB on v5e/v6e (128 MiB physical)."""
    try:
        phys = int(pltpu.get_tpu_info().vmem_capacity_bytes)
        return 48 * 1024 * 1024 if phys <= 64 * 1024 * 1024 else 64 * 1024 * 1024
    except Exception:
        return 48 * 1024 * 1024


# ----------------------------------------------------------------------------
# Kernel A: roots + rule tables + term MLP (single invocation)
# ----------------------------------------------------------------------------

def grammar_kernel(rule_emb_ref, root_emb_ref, term_w_ref, term_b_ref,
                   parent_w_ref, parent_b_ref, left_w_ref, left_b_ref,
                   right_w_ref, right_b_ref,
                   root_ref, left_t_ref, right_t_ref, h_ref):
    nt = left_t_ref.shape[0]

    def mm(a, b):
        return jnp.dot(a.astype(_MXU_DTYPE), b.astype(_MXU_DTYPE),
                       preferred_element_type=jnp.float32)

    def mm_t(a, b):        # a @ b.T : contract the trailing feature axis of both
        return jax.lax.dot_general(
            a.astype(_MXU_DTYPE), b.astype(_MXU_DTYPE),
            (((1,), (1,)), ((), ())), preferred_element_type=jnp.float32)

    emb = rule_emb_ref[...]                         # (NT+T, S) bf16
    nt_emb = emb[:nt, :]                            # (NT, S)
    term_emb = emb[nt:, :]                          # (T, S)

    # roots: log_softmax over the lane (NT) axis
    r = mm_t(root_emb_ref[...], nt_emb)             # (1, NT) f32
    r_max = jnp.max(r, axis=-1, keepdims=True)
    r_lse = jnp.log(jnp.sum(jnp.exp(r - r_max), axis=-1, keepdims=True)) + r_max
    root_ref[...] = r - r_lse

    # rule tables, computed transposed so the child softmax reduces over lanes
    def proj(z, w_ref, b_ref):                      # ReLU(z @ W + b) + z
        return (jnp.maximum(mm(z, w_ref[...]) + b_ref[...], 0.0)
                + z.astype(jnp.float32))

    parent1 = proj(nt_emb, parent_w_ref, parent_b_ref)        # (NT, S)
    left_h = proj(emb, left_w_ref, left_b_ref)                # (NT+T, S)
    right_h = proj(emb, right_w_ref, right_b_ref)             # (NT+T, S)

    def child_softmax_t(h):
        z = mm_t(parent1, h)                                   # (NT, NT+T), lane-dense
        z_max = jnp.max(z, axis=-1, keepdims=True)
        ez = jnp.exp(z - z_max)
        return ez / jnp.sum(ez, axis=-1, keepdims=True)        # exact denominator

    left_t_ref[...] = child_softmax_t(left_h)
    right_t_ref[...] = child_softmax_t(right_h)

    # term MLP: Linear + 3x ResLayer(Linear,ReLU,Linear,ReLU, +res), then +emb
    h = mm(term_emb, term_w_ref[0]) + term_b_ref[0]
    for i in range(3):
        a = jnp.maximum(mm(h, term_w_ref[1 + 2 * i]) + term_b_ref[1 + 2 * i], 0.0)
        a = jnp.maximum(mm(a, term_w_ref[2 + 2 * i]) + term_b_ref[2 + 2 * i], 0.0)
        h = a + h
    h_ref[...] = h + term_emb.astype(jnp.float32)              # (T, S) f32


def compute_grammar(params):
    NT, T = params['NT'], params['T']
    emb = params['rule_state_emb'].astype(_MXU_DTYPE)
    M, S = emb.shape

    def c2(i):
        return (0, 0)

    def c3(i):
        return (0, 0, 0)

    flops = (2 * S * S * (7 * T + NT + 2 * M)       # MLPs / projections
             + 2 * NT * S * (2 * M + 1))            # score matmuls + root
    transcendentals = 2 * NT * M + NT
    bytes_accessed = (2 * (M * S + S + 10 * S * S) + 4 * 10 * S
                      + 4 * (NT + 2 * NT * M + T * S))

    out_shapes = (
        jax.ShapeDtypeStruct((1, NT), jnp.float32),     # root log-probs
        jax.ShapeDtypeStruct((NT, M), jnp.float32),     # left^T  (lane-dense)
        jax.ShapeDtypeStruct((NT, M), jnp.float32),     # right^T (lane-dense)
        jax.ShapeDtypeStruct((T, S), jnp.float32),      # term-MLP output h
    )
    in_specs = [
        pl.BlockSpec((M, S), c2),                       # rule_state_emb
        pl.BlockSpec((1, S), c2),                       # root_emb
        pl.BlockSpec((7, S, S), c3),                    # term_W
        pl.BlockSpec((7, 1, S), c3),                    # term_b (f32)
        pl.BlockSpec((S, S), c2), pl.BlockSpec((1, S), c2),   # parent
        pl.BlockSpec((S, S), c2), pl.BlockSpec((1, S), c2),   # left
        pl.BlockSpec((S, S), c2), pl.BlockSpec((1, S), c2),   # right
    ]
    out_specs = (
        pl.BlockSpec((1, NT), c2),
        pl.BlockSpec((NT, M), c2),
        pl.BlockSpec((NT, M), c2),
        pl.BlockSpec((T, S), c2),
    )
    return pl.pallas_call(
        grammar_kernel,
        out_shape=out_shapes,
        grid_spec=pltpu.PrefetchScalarGridSpec(
            num_scalar_prefetch=0, grid=(1,),
            in_specs=in_specs, out_specs=out_specs),
        compiler_params=pltpu.CompilerParams(
            dimension_semantics=("arbitrary",),
            vmem_limit_bytes=_vmem_limit_bytes()),
        cost_estimate=pl.CostEstimate(flops=flops,
                                      transcendentals=transcendentals,
                                      bytes_accessed=bytes_accessed),
    )(emb, params['root_emb'].astype(_MXU_DTYPE),
      params['term_W'].astype(_MXU_DTYPE), params['term_b'],
      params['parent_W'].astype(_MXU_DTYPE), params['parent_b'],
      params['left_W'].astype(_MXU_DTYPE), params['left_b'],
      params['right_W'].astype(_MXU_DTYPE), params['right_b'])


# ----------------------------------------------------------------------------
# Kernel B: streamed vocab logits + online log-sum-exp
# grid = (NUM_CORES, V_chunks) = ("parallel", "arbitrary")
# ----------------------------------------------------------------------------

def vocab_stream_kernel(h_t_ref, vocab_ref, logits_ref, lse_ref, m_ref, l_ref,
                        *, v_valid, v_chunk, chunks_per_core):
    c = pl.program_id(0)
    v = pl.program_id(1)

    @pl.when(v == 0)
    def _init():
        m_ref[...] = jnp.full(m_ref.shape, _NEG, jnp.float32)
        l_ref[...] = jnp.zeros(l_ref.shape, jnp.float32)

    # canonical MXU orientation: (v_chunk, S) @ (S, T_pad) -> (v_chunk, T_pad)
    z = jnp.dot(vocab_ref[...], h_t_ref[...], preferred_element_type=jnp.float32)
    logits_ref[...] = z                                   # lane-dense, unmasked vst

    # mask vocab-padding rows out of the online log-sum-exp
    row0 = (c * chunks_per_core + v) * v_chunk
    rows = jax.lax.broadcasted_iota(jnp.int32, z.shape, 0)
    z_m = jnp.where(rows < (v_valid - row0), z, _NEG)

    chunk_max = jnp.max(z_m, axis=0, keepdims=True)       # (1, T_pad)
    m_prev = m_ref[...]
    m_new = jnp.maximum(m_prev, chunk_max)
    l_ref[...] = (l_ref[...] * jnp.exp(m_prev - m_new)
                  + jnp.sum(jnp.exp(z_m - m_new), axis=0, keepdims=True))
    m_ref[...] = m_new

    @pl.when(v == pl.num_programs(1) - 1)
    def _finalize():
        lse_ref[...] = jnp.broadcast_to(m_ref[...] + jnp.log(l_ref[...]),
                                        lse_ref.shape)


def compute_vocab_logits(h, vocab_emb):
    """h: (T, S) f32 term-MLP output; vocab_emb: (S, V) f32 parameter."""
    T, S = h.shape
    V = vocab_emb.shape[1]
    T_pad = _round_up(T, 128)
    v_chunk = min(_V_CHUNK_TARGET, _round_up(_cdiv(V, _NUM_CORES), 128))
    cpc = _cdiv(V, _NUM_CORES * v_chunk)                  # vocab chunks per core
    V_pad = _NUM_CORES * cpc * v_chunk

    # canonical layouts for the streamed matmul (in production, store the vocab
    # parameter pre-transposed as (V, S) bf16 to avoid this per-forward transpose)
    h_t = jnp.pad(h.astype(_MXU_DTYPE).T, ((0, 0), (0, T_pad - T)))      # (S, T_pad)
    vocab_t = jnp.pad(vocab_emb.T.astype(_MXU_DTYPE),
                      ((0, V_pad - V), (0, 0)))                           # (V_pad, S)

    kernel = functools.partial(vocab_stream_kernel, v_valid=V,
                               v_chunk=v_chunk, chunks_per_core=cpc)

    logits, lse8 = pl.pallas_call(
        kernel,
        out_shape=(jax.ShapeDtypeStruct((V_pad, T_pad), jnp.float32),
                   jax.ShapeDtypeStruct((_NUM_CORES * 8, T_pad), jnp.float32)),
        grid_spec=pltpu.PrefetchScalarGridSpec(
            num_scalar_prefetch=0, grid=(_NUM_CORES, cpc),
            in_specs=[
                pl.BlockSpec((S, T_pad), lambda c, v: (0, 0)),            # h^T (resident)
                pl.BlockSpec((v_chunk, S), lambda c, v: (c * cpc + v, 0)),  # vocab (streamed)
            ],
            out_specs=(
                pl.BlockSpec((v_chunk, T_pad), lambda c, v: (c * cpc + v, 0)),
                pl.BlockSpec((8, T_pad), lambda c, v: (c, 0)),            # per-core LSE
            ),
            scratch_shapes=[pltpu.VMEM((1, T_pad), jnp.float32),          # running max
                            pltpu.VMEM((1, T_pad), jnp.float32)]),        # running sum-exp
        compiler_params=pltpu.CompilerParams(
            dimension_semantics=("parallel", "arbitrary"),
            vmem_limit_bytes=_vmem_limit_bytes()),
        cost_estimate=pl.CostEstimate(
            flops=2 * V_pad * S * T_pad,
            transcendentals=2 * V_pad * T_pad,
            bytes_accessed=2 * (V_pad * S + S * T_pad)
                           + 4 * (V_pad * T_pad + _NUM_CORES * 8 * T_pad)),
    )(h_t, vocab_t)

    # merge the per-core partial LSEs (tiny: (NUM_CORES, T_pad))
    lse_parts = lse8[::8]                                  # (NUM_CORES, T_pad)
    m = jnp.max(lse_parts, axis=0, keepdims=True)
    lse = m + jnp.log(jnp.sum(jnp.exp(lse_parts - m), axis=0, keepdims=True))
    return logits, lse


# ----------------------------------------------------------------------------
# Kernel C: per-token row gather of the unnormalized logits, minus LSE
# grid = (BN_pad // tb,), "arbitrary"; ids in SMEM; rows DMA'd from HBM with a
# cross-step double buffer.
# ----------------------------------------------------------------------------

def unary_gather_kernel(ids_ref, lse_ref, logits_hbm, out_ref, buf, sems):
    tb = out_ref.shape[0]
    i = pl.program_id(0)
    n = pl.num_programs(0)
    slot = jax.lax.rem(i, 2)

    def issue(tile, slot_idx):
        base = tile * tb
        for r in range(tb):                                # static, fully unrolled
            row = ids_ref[base + r]                        # SMEM scalar read
            pltpu.make_async_copy(logits_hbm.at[pl.ds(row, 1)],     # (1, T_pad) row
                                  buf.at[slot_idx, pl.ds(r, 1)],
                                  sems.at[slot_idx, r]).start()

    @pl.when(i == 0)
    def _prime():
        issue(0, 0)

    @pl.when(i + 1 < n)
    def _prefetch_next():                                  # overlap with this tile
        issue(i + 1, 1 - slot)

    for r in range(tb):                                    # wait on this tile's rows
        pltpu.make_async_copy(logits_hbm.at[pl.ds(0, 1)],
                              buf.at[slot, pl.ds(r, 1)],
                              sems.at[slot, r]).wait()

    out_ref[...] = buf[slot] - lse_ref[...]                # log_softmax row gather


def compute_unary(x_flat, logits, lse, n_valid_rows):
    bn = x_flat.shape[0]
    V_pad, T_pad = logits.shape
    tb = _TOKENS_PER_STEP
    bn_pad = _round_up(bn, tb)
    ids = jnp.clip(x_flat.astype(jnp.int32), 0, n_valid_rows - 1)   # guard OOB DMA rows
    if bn_pad != bn:
        ids = jnp.concatenate([ids, jnp.zeros((bn_pad - bn,), jnp.int32)])
    grid = (bn_pad // tb,)

    unary = pl.pallas_call(
        unary_gather_kernel,
        out_shape=jax.ShapeDtypeStruct((bn_pad, T_pad), jnp.float32),
        grid_spec=pltpu.PrefetchScalarGridSpec(
            num_scalar_prefetch=1,                         # word ids -> SMEM
            grid=grid,
            in_specs=[
                pl.BlockSpec((1, T_pad), lambda i, ids_smem: (0, 0)),   # lse
                pl.BlockSpec(memory_space=pl.ANY),                      # logits in HBM
            ],
            out_specs=pl.BlockSpec((tb, T_pad), lambda i, ids_smem: (i, 0)),
            scratch_shapes=[
                pltpu.VMEM((2, tb, T_pad), jnp.float32),   # double-buffered rows
                pltpu.SemaphoreType.DMA((2, tb)),
            ]),
        compiler_params=pltpu.CompilerParams(
            # "arbitrary": the cross-step scratch/semaphore carry of the double
            # buffer is not valid across a megacore core split.
            dimension_semantics=("arbitrary",),
            vmem_limit_bytes=16 * 1024 * 1024),
        cost_estimate=pl.CostEstimate(
            flops=bn_pad * T_pad, transcendentals=0,
            bytes_accessed=4 * (2 * bn_pad * T_pad + T_pad) + 4 * bn_pad),
    )(ids, lse, logits)
    return unary[:bn]


# ----------------------------------------------------------------------------
# Forward wrapper (same outputs as the PyTorch module's forward)
# ----------------------------------------------------------------------------

def simple_n_pcfg_forward(params, x):
    """x: (b, n) int32 word ids. Returns the same dict as the PyTorch forward."""
    b, n = x.shape
    NT, T = params['NT'], params['T']
    V = params['vocab_emb'].shape[1]

    root1, left_t, right_t, h = compute_grammar(params)
    logits, lse = compute_vocab_logits(h, params['vocab_emb'])

    root = jnp.broadcast_to(root1, (b, NT))
    # TODO(synk): a downstream Pallas inside-algorithm kernel should consume the
    # lane-dense (NT, NT+T) layout directly instead of these wrapper transposes.
    left = left_t.T
    right = right_t.T
    left_m, left_p = left[:NT], left[NT:]
    right_m, right_p = right[:NT], right[NT:]

    x_flat = x.reshape(b * n).astype(jnp.int32)
    unary = compute_unary(x_flat, logits, lse, V)[:, :T].reshape(b, n, T)

    return {'unary': unary, 'root': root,
            'left_m': left_m, 'right_m': right_m,
            'left_p': left_p, 'right_p': right_p, 'kl': 0}


# ----------------------------------------------------------------------------
# Pure-JAX reference (same bf16 MXU-operand rounding, f32 accumulation)
# ----------------------------------------------------------------------------

def reference_forward(params, x):
    NT, T = params['NT'], params['T']
    b, n = x.shape

    def mm(a, b_):
        return jnp.dot(a.astype(_MXU_DTYPE), b_.astype(_MXU_DTYPE),
                       preferred_element_type=jnp.float32)

    q = lambda a: a.astype(_MXU_DTYPE).astype(jnp.float32)   # parameter rounding
    emb = q(params['rule_state_emb'])
    root_emb = q(params['root_emb'])

    root = jax.nn.log_softmax(mm(root_emb, emb[:NT].T), axis=-1)
    root = jnp.broadcast_to(root, (b, NT))

    e = emb[NT:]
    h = mm(e, params['term_W'][0]) + params['term_b'][0]
    for i in range(3):
        a = jax.nn.relu(mm(h, params['term_W'][1 + 2 * i]) + params['term_b'][1 + 2 * i])
        a = jax.nn.relu(mm(a, params['term_W'][2 + 2 * i]) + params['term_b'][2 + 2 * i])
        h = a + h
    term_prob = jax.nn.log_softmax(mm(h + e, params['vocab_emb']), axis=-1)   # (T, V)
    unary = term_prob.T[x]                                                     # (b, n, T)

    nt_emb = emb[:NT]
    parent1 = jax.nn.relu(mm(nt_emb, params['parent_W']) + params['parent_b']) + nt_emb
    left_h = jax.nn.relu(mm(emb, params['left_W']) + params['left_b']) + emb
    right_h = jax.nn.relu(mm(emb, params['right_W']) + params['right_b']) + emb
    left = jax.nn.softmax(mm(left_h, parent1.T), axis=-2)
    right = jax.nn.softmax(mm(right_h, parent1.T), axis=-2)
    return {'unary': unary, 'root': root,
            'left_m': left[:NT], 'left_p': left[NT:],
            'right_m': right[:NT], 'right_p': right[NT:], 'kl': 0}


# ----------------------------------------------------------------------------
# Deterministic parameter init (xavier-uniform like the module's _initialize)
# ----------------------------------------------------------------------------

def _xavier(key, shape):
    fan_out, fan_in = shape[0], shape[1]
    bound = (6.0 / (fan_in + fan_out)) ** 0.5
    return jax.random.uniform(key, shape, jnp.float32, -bound, bound)


def _bias(key, s):
    bound = 1.0 / (s ** 0.5)
    return jax.random.uniform(key, (1, s), jnp.float32, -bound, bound)


def init_params(key, NT, T, V, S):
    keys = iter(jax.random.split(key, 32))
    params = {
        'NT': NT, 'T': T,
        'root_emb': _xavier(next(keys), (1, S)),
        'rule_state_emb': _xavier(next(keys), (NT + T, S)),
        'vocab_emb': _xavier(next(keys), (S, V)),
        'term_W': jnp.stack([_xavier(next(keys), (S, S)) for _ in range(7)]),
        'term_b': jnp.stack([_bias(next(keys), S) for _ in range(7)]),   # (7, 1, S)
        'left_W': _xavier(next(keys), (S, S)),  'left_b': _bias(next(keys), S),
        'right_W': _xavier(next(keys), (S, S)), 'right_b': _bias(next(keys), S),
        'parent_W': _xavier(next(keys), (S, S)), 'parent_b': _bias(next(keys), S),
    }
    return params


# ----------------------------------------------------------------------------

if __name__ == "__main__":
    key = jax.random.PRNGKey(0)
    k_params, k_x = jax.random.split(key)

    b, n = 2, 8
    NT, T, V, S = 8, 16, 64, 32

    params = init_params(k_params, NT, T, V, S)
    x = jax.random.randint(k_x, (b, n), 0, V, dtype=jnp.int32)

    out = simple_n_pcfg_forward(params, x)
    jax.block_until_ready((out['unary'], out['root'], out['left_m'],
                           out['left_p'], out['right_m'], out['right_p']))

    ref = reference_forward(params, x)
    # Both paths use identical bf16 MXU-operand rounding with f32 accumulation,
    # so the only differences are accumulation order / exp-log implementations.
    tol = dict(atol=1e-3, rtol=1e-2)
    for name in ('unary', 'root', 'left_m', 'left_p', 'right_m', 'right_p'):
        assert jnp.allclose(out[name], ref[name], **tol), name

    print("KERNEL_OK")
</pallas_src>

<mosaic_0001>
module attributes {stable_mosaic.version = 11 : i64} {
  func.func @grammar_kernel(%arg0: i32, %arg1: memref<24x32xbf16, #tpu.memory_space<vmem>>, %arg2: memref<1x32xbf16, #tpu.memory_space<vmem>>, %arg3: memref<7x32x32xbf16, #tpu.memory_space<vmem>>, %arg4: memref<7x1x32xf32, #tpu.memory_space<vmem>>, %arg5: memref<32x32xbf16, #tpu.memory_space<vmem>>, %arg6: memref<1x32xf32, #tpu.memory_space<vmem>>, %arg7: memref<32x32xbf16, #tpu.memory_space<vmem>>, %arg8: memref<1x32xf32, #tpu.memory_space<vmem>>, %arg9: memref<32x32xbf16, #tpu.memory_space<vmem>>, %arg10: memref<1x32xf32, #tpu.memory_space<vmem>>, %arg11: memref<1x8xf32, #tpu.memory_space<vmem>>, %arg12: memref<8x24xf32, #tpu.memory_space<vmem>>, %arg13: memref<8x24xf32, #tpu.memory_space<vmem>>, %arg14: memref<16x32xf32, #tpu.memory_space<vmem>>) attributes {dimension_semantics = [#tpu.dimension_semantics<arbitrary>], iteration_bounds = array<i64: 1>, scalar_prefetch = 0 : i64, scratch_operands = 0 : i64, tpu.core_type = #tpu.core_type<tc>, window_params = [{pipeline_mode = #tpu.pipeline_mode<synchronous>, transform_indices = @transform_0, window_bounds = array<i64: 24, 32>}, {pipeline_mode = #tpu.pipeline_mode<synchronous>, transform_indices = @transform_1, window_bounds = array<i64: 1, 32>}, {pipeline_mode = #tpu.pipeline_mode<synchronous>, transform_indices = @transform_2, window_bounds = array<i64: 7, 32, 32>}, {pipeline_mode = #tpu.pipeline_mode<synchronous>, transform_indices = @transform_3, window_bounds = array<i64: 7, 1, 32>}, {pipeline_mode = #tpu.pipeline_mode<synchronous>, transform_indices = @transform_4, window_bounds = array<i64: 32, 32>}, {pipeline_mode = #tpu.pipeline_mode<synchronous>, transform_indices = @transform_5, window_bounds = array<i64: 1, 32>}, {pipeline_mode = #tpu.pipeline_mode<synchronous>, transform_indices = @transform_6, window_bounds = array<i64: 32, 32>}, {pipeline_mode = #tpu.pipeline_mode<synchronous>, transform_indices = @transform_7, window_bounds = array<i64: 1, 32>}, {pipeline_mode = #tpu.pipeline_mode<synchronous>, transform_indices = @transform_8, window_bounds = array<i64: 32, 32>}, {pipeline_mode = #tpu.pipeline_mode<synchronous>, transform_indices = @transform_9, window_bounds = array<i64: 1, 32>}, {pipeline_mode = #tpu.pipeline_mode<synchronous>, transform_indices = @transform_10, window_bounds = array<i64: 1, 8>}, {pipeline_mode = #tpu.pipeline_mode<synchronous>, transform_indices = @transform_11, window_bounds = array<i64: 8, 24>}, {pipeline_mode = #tpu.pipeline_mode<synchronous>, transform_indices = @transform_12, window_bounds = array<i64: 8, 24>}, {pipeline_mode = #tpu.pipeline_mode<synchronous>, transform_indices = @transform_13, window_bounds = array<i64: 16, 32>}]} {
    %c0 = arith.constant 0 : index
    %c0_0 = arith.constant 0 : index
    %0 = vector.load %arg1[%c0, %c0_0] : memref<24x32xbf16, #tpu.memory_space<vmem>>, vector<24x32xbf16>
    %1 = vector.extract_strided_slice %0 {offsets = [0, 0], sizes = [8, 32], strides = [1, 1]} : vector<24x32xbf16> to vector<8x32xbf16>
    %2 = vector.extract_strided_slice %0 {offsets = [8, 0], sizes = [16, 32], strides = [1, 1]} : vector<24x32xbf16> to vector<16x32xbf16>
    %c0_1 = arith.constant 0 : index
    %c0_2 = arith.constant 0 : index
    %3 = vector.load %arg2[%c0_1, %c0_2] : memref<1x32xbf16, #tpu.memory_space<vmem>>, vector<1x32xbf16>
    %cst = arith.constant dense<0.000000e+00> : vector<1x8xf32>
    %4 = tpu.matmul %3, %1, %cst {dimension_numbers = #tpu.dot_dimension_numbers<[1], [1], [0], [0], [0, 0, 1, 0], [], []>} : vector<1x32xbf16>, vector<8x32xbf16>, vector<1x8xf32> -> vector<1x8xf32>
    %cst_3 = arith.constant dense<0xFF800000> : vector<1xf32>
    %5 = vector.multi_reduction <maximumf>, %4, %cst_3 [1] : vector<1x8xf32> to vector<1xf32>
    %6 = vector.shape_cast %5 : vector<1xf32> to vector<1x1xf32>
    %7 = vector.broadcast %6 : vector<1x1xf32> to vector<1x8xf32>
    %8 = arith.subf %4, %7 : vector<1x8xf32>
    %9 = math.exp %8 : vector<1x8xf32>
    %cst_4 = arith.constant dense<0.000000e+00> : vector<1xf32>
    %10 = vector.multi_reduction <add>, %9, %cst_4 [1] : vector<1x8xf32> to vector<1xf32>
    %11 = vector.shape_cast %10 : vector<1xf32> to vector<1x1xf32>
    %12 = math.log %11 : vector<1x1xf32>
    %13 = arith.addf %12, %6 : vector<1x1xf32>
    %14 = vector.broadcast %13 : vector<1x1xf32> to vector<1x8xf32>
    %15 = arith.subf %4, %14 : vector<1x8xf32>
    %c0_5 = arith.constant 0 : index
    %c0_6 = arith.constant 0 : index
    %16 = vector.load %arg11[%c0_5, %c0_6] : memref<1x8xf32, #tpu.memory_space<vmem>>, vector<1x8xf32>
    tpu.vector_store %arg11[%c0_5, %c0_6], %15 {strides = array<i32>} : memref<1x8xf32, #tpu.memory_space<vmem>>, vector<1x8xf32>,
    %c0_7 = arith.constant 0 : index
    %c0_8 = arith.constant 0 : index
    %17 = vector.load %arg5[%c0_7, %c0_8] : memref<32x32xbf16, #tpu.memory_space<vmem>>, vector<32x32xbf16>
    %cst_9 = arith.constant dense<0.000000e+00> : vector<8x32xf32>
    %18 = tpu.matmul %1, %17, %cst_9 {dimension_numbers = #tpu.dot_dimension_numbers<[1], [0], [0], [1], [0, 0, 1, 1], [], []>} : vector<8x32xbf16>, vector<32x32xbf16>, vector<8x32xf32> -> vector<8x32xf32>
    %c0_10 = arith.constant 0 : index
    %c0_11 = arith.constant 0 : index
    %19 = vector.load %arg6[%c0_10, %c0_11] : memref<1x32xf32, #tpu.memory_space<vmem>>, vector<1x32xf32>
    %20 = vector.broadcast %19 : vector<1x32xf32> to vector<8x32xf32>
    %21 = arith.addf %18, %20 : vector<8x32xf32>
    %cst_12 = arith.constant 0.000000e+00 : f32
    %22 = vector.broadcast %cst_12 : f32 to vector<8x32xf32>
    %23 = arith.maximumf %21, %22 : vector<8x32xf32>
    %24 = arith.extf %1 : vector<8x32xbf16> to vector<8x32xf32>
    %25 = arith.addf %23, %24 : vector<8x32xf32>
    %c0_13 = arith.constant 0 : index
    %c0_14 = arith.constant 0 : index
    %26 = vector.load %arg7[%c0_13, %c0_14] : memref<32x32xbf16, #tpu.memory_space<vmem>>, vector<32x32xbf16>
    %cst_15 = arith.constant dense<0.000000e+00> : vector<24x32xf32>
    %27 = tpu.matmul %0, %26, %cst_15 {dimension_numbers = #tpu.dot_dimension_numbers<[1], [0], [0], [1], [0, 0, 1, 1], [], []>} : vector<24x32xbf16>, vector<32x32xbf16>, vector<24x32xf32> -> vector<24x32xf32>
    %c0_16 = arith.constant 0 : index
    %c0_17 = arith.constant 0 : index
    %28 = vector.load %arg8[%c0_16, %c0_17] : memref<1x32xf32, #tpu.memory_space<vmem>>, vector<1x32xf32>
    %29 = vector.broadcast %28 : vector<1x32xf32> to vector<24x32xf32>
    %30 = arith.addf %27, %29 : vector<24x32xf32>
    %cst_18 = arith.constant 0.000000e+00 : f32
    %31 = vector.broadcast %cst_18 : f32 to vector<24x32xf32>
    %32 = arith.maximumf %30, %31 : vector<24x32xf32>
    %33 = arith.extf %0 : vector<24x32xbf16> to vector<24x32xf32>
    %34 = arith.addf %32, %33 : vector<24x32xf32>
    %c0_19 = arith.constant 0 : index
    %c0_20 = arith.constant 0 : index
    %35 = vector.load %arg9[%c0_19, %c0_20] : memref<32x32xbf16, #tpu.memory_space<vmem>>, vector<32x32xbf16>
    %cst_21 = arith.constant dense<0.000000e+00> : vector<24x32xf32>
    %36 = tpu.matmul %0, %35, %cst_21 {dimension_numbers = #tpu.dot_dimension_numbers<[1], [0], [0], [1], [0, 0, 1, 1], [], []>} : vector<24x32xbf16>, vector<32x32xbf16>, vector<24x32xf32> -> vector<24x32xf32>
    %c0_22 = arith.constant 0 : index
    %c0_23 = arith.constant 0 : index
    %37 = vector.load %arg10[%c0_22, %c0_23] : memref<1x32xf32, #tpu.memory_space<vmem>>, vector<1x32xf32>
    %38 = vector.broadcast %37 : vector<1x32xf32> to vector<24x32xf32>
    %39 = arith.addf %36, %38 : vector<24x32xf32>
    %cst_24 = arith.constant 0.000000e+00 : f32
    %40 = vector.broadcast %cst_24 : f32 to vector<24x32xf32>
    %41 = arith.maximumf %39, %40 : vector<24x32xf32>
    %42 = arith.extf %0 : vector<24x32xbf16> to vector<24x32xf32>
    %43 = arith.addf %41, %42 : vector<24x32xf32>
    %44 = arith.truncf %25 : vector<8x32xf32> to vector<8x32xbf16>
    %45 = arith.truncf %34 : vector<24x32xf32> to vector<24x32xbf16>
    %cst_25 = arith.constant dense<0.000000e+00> : vector<8x24xf32>
    %46 = tpu.matmul %44, %45, %cst_25 {dimension_numbers = #tpu.dot_dimension_numbers<[1], [1], [0], [0], [0, 0, 1, 0], [], []>} : vector<8x32xbf16>, vector<24x32xbf16>, vector<8x24xf32> -> vector<8x24xf32>
    %cst_26 = arith.constant dense<0xFF800000> : vector<8xf32>
    %47 = vector.multi_reduction <maximumf>, %46, %cst_26 [1] : vector<8x24xf32> to vector<8xf32>
    %48 = vector.shape_cast %47 : vector<8xf32> to vector<8x1xf32>
    %49 = vector.broadcast %48 : vector<8x1xf32> to vector<8x24xf32>
    %50 = arith.subf %46, %49 : vector<8x24xf32>
    %51 = math.exp %50 : vector<8x24xf32>
    %cst_27 = arith.constant dense<0.000000e+00> : vector<8xf32>
    %52 = vector.multi_reduction <add>, %51, %cst_27 [1] : vector<8x24xf32> to vector<8xf32>
    %53 = vector.shape_cast %52 : vector<8xf32> to vector<8x1xf32>
    %54 = vector.broadcast %53 : vector<8x1xf32> to vector<8x24xf32>
    %55 = arith.divf %51, %54 : vector<8x24xf32>
    %c0_28 = arith.constant 0 : index
    %c0_29 = arith.constant 0 : index
    %56 = vector.load %arg12[%c0_28, %c0_29] : memref<8x24xf32, #tpu.memory_space<vmem>>, vector<8x24xf32>
    tpu.vector_store %arg12[%c0_28, %c0_29], %55 {strides = array<i32>} : memref<8x24xf32, #tpu.memory_space<vmem>>, vector<8x24xf32>,
    %57 = arith.truncf %25 : vector<8x32xf32> to vector<8x32xbf16>
    %58 = arith.truncf %43 : vector<24x32xf32> to vector<24x32xbf16>
    %cst_30 = arith.constant dense<0.000000e+00> : vector<8x24xf32>
    %59 = tpu.matmul %57, %58, %cst_30 {dimension_numbers = #tpu.dot_dimension_numbers<[1], [1], [0], [0], [0, 0, 1, 0], [], []>} : vector<8x32xbf16>, vector<24x32xbf16>, vector<8x24xf32> -> vector<8x24xf32>
    %cst_31 = arith.constant dense<0xFF800000> : vector<8xf32>
    %60 = vector.multi_reduction <maximumf>, %59, %cst_31 [1] : vector<8x24xf32> to vector<8xf32>
    %61 = vector.shape_cast %60 : vector<8xf32> to vector<8x1xf32>
    %62 = vector.broadcast %61 : vector<8x1xf32> to vector<8x24xf32>
    %63 = arith.subf %59, %62 : vector<8x24xf32>
    %64 = math.exp %63 : vector<8x24xf32>
    %cst_32 = arith.constant dense<0.000000e+00> : vector<8xf32>
    %65 = vector.multi_reduction <add>, %64, %cst_32 [1] : vector<8x24xf32> to vector<8xf32>
    %66 = vector.shape_cast %65 : vector<8xf32> to vector<8x1xf32>
    %67 = vector.broadcast %66 : vector<8x1xf32> to vector<8x24xf32>
    %68 = arith.divf %64, %67 : vector<8x24xf32>
    %c0_33 = arith.constant 0 : index
    %c0_34 = arith.constant 0 : index
    %69 = vector.load %arg13[%c0_33, %c0_34] : memref<8x24xf32, #tpu.memory_space<vmem>>, vector<8x24xf32>
    tpu.vector_store %arg13[%c0_33, %c0_34], %68 {strides = array<i32>} : memref<8x24xf32, #tpu.memory_space<vmem>>, vector<8x24xf32>,
    %c0_35 = arith.constant 0 : index
    %c0_36 = arith.constant 0 : index
    %c0_37 = arith.constant 0 : index
    %70 = vector.load %arg3[%c0_35, %c0_36, %c0_37] : memref<7x32x32xbf16, #tpu.memory_space<vmem>>, vector<1x32x32xbf16>
    %71 = vector.shape_cast %70 : vector<1x32x32xbf16> to vector<32x32xbf16>
    %cst_38 = arith.constant dense<0.000000e+00> : vector<16x32xf32>
    %72 = tpu.matmul %2, %71, %cst_38 {dimension_numbers = #tpu.dot_dimension_numbers<[1], [0], [0], [1], [0, 0, 1, 1], [], []>} : vector<16x32xbf16>, vector<32x32xbf16>, vector<16x32xf32> -> vector<16x32xf32>
    %c0_39 = arith.constant 0 : index
    %c0_40 = arith.constant 0 : index
    %c0_41 = arith.constant 0 : index
    %73 = vector.load %arg4[%c0_39, %c0_40, %c0_41] : memref<7x1x32xf32, #tpu.memory_space<vmem>>, vector<1x1x32xf32>
    %74 = vector.shape_cast %73 : vector<1x1x32xf32> to vector<1x32xf32>
    %75 = vector.broadcast %74 : vector<1x32xf32> to vector<16x32xf32>
    %76 = arith.addf %72, %75 : vector<16x32xf32>
    %c1 = arith.constant 1 : index
    %c0_42 = arith.constant 0 : index
    %c0_43 = arith.constant 0 : index
    %77 = vector.load %arg3[%c1, %c0_42, %c0_43] : memref<7x32x32xbf16, #tpu.memory_space<vmem>>, vector<1x32x32xbf16>
    %78 = vector.shape_cast %77 : vector<1x32x32xbf16> to vector<32x32xbf16>
    %79 = arith.truncf %76 : vector<16x32xf32> to vector<16x32xbf16>
    %cst_44 = arith.constant dense<0.000000e+00> : vector<16x32xf32>
    %80 = tpu.matmul %79, %78, %cst_44 {dimension_numbers = #tpu.dot_dimension_numbers<[1], [0], [0], [1], [0, 0, 1, 1], [], []>} : vector<16x32xbf16>, vector<32x32xbf16>, vector<16x32xf32> -> vector<16x32xf32>
    %c1_45 = arith.constant 1 : index
    %c0_46 = arith.constant 0 : index
    %c0_47 = arith.constant 0 : index
    %81 = vector.load %arg4[%c1_45, %c0_46, %c0_47] : memref<7x1x32xf32, #tpu.memory_space<vmem>>, vector<1x1x32xf32>
    %82 = vector.shape_cast %81 : vector<1x1x32xf32> to vector<1x32xf32>
    %83 = vector.broadcast %82 : vector<1x32xf32> to vector<16x32xf32>
    %84 = arith.addf %80, %83 : vector<16x32xf32>
    %cst_48 = arith.constant 0.000000e+00 : f32
    %85 = vector.broadcast %cst_48 : f32 to vector<16x32xf32>
    %86 = arith.maximumf %84, %85 : vector<16x32xf32>
    %c2 = arith.constant 2 : index
    %c0_49 = arith.constant 0 : index
    %c0_50 = arith.constant 0 : index
    %87 = vector.load %arg3[%c2, %c0_49, %c0_50] : memref<7x32x32xbf16, #tpu.memory_space<vmem>>, vector<1x32x32xbf16>
    %88 = vector.shape_cast %87 : vector<1x32x32xbf16> to vector<32x32xbf16>
    %89 = arith.truncf %86 : vector<16x32xf32> to vector<16x32xbf16>
    %cst_51 = arith.constant dense<0.000000e+00> : vector<16x32xf32>
    %90 = tpu.matmul %89, %88, %cst_51 {dimension_numbers = #tpu.dot_dimension_numbers<[1], [0], [0], [1], [0, 0, 1, 1], [], []>} : vector<16x32xbf16>, vector<32x32xbf16>, vector<16x32xf32> -> vector<16x32xf32>
    %c2_52 = arith.constant 2 : index
    %c0_53 = arith.constant 0 : index
    %c0_54 = arith.constant 0 : index
    %91 = vector.load %arg4[%c2_52, %c0_53, %c0_54] : memref<7x1x32xf32, #tpu.memory_space<vmem>>, vector<1x1x32xf32>
    %92 = vector.shape_cast %91 : vector<1x1x32xf32> to vector<1x32xf32>
    %93 = vector.broadcast %92 : vector<1x32xf32> to vector<16x32xf32>
    %94 = arith.addf %90, %93 : vector<16x32xf32>
    %cst_55 = arith.constant 0.000000e+00 : f32
    %95 = vector.broadcast %cst_55 : f32 to vector<16x32xf32>
    %96 = arith.maximumf %94, %95 : vector<16x32xf32>
    %97 = arith.addf %96, %76 : vector<16x32xf32>
    %c3 = arith.constant 3 : index
    %c0_56 = arith.constant 0 : index
    %c0_57 = arith.constant 0 : index
    %98 = vector.load %arg3[%c3, %c0_56, %c0_57] : memref<7x32x32xbf16, #tpu.memory_space<vmem>>, vector<1x32x32xbf16>
    %99 = vector.shape_cast %98 : vector<1x32x32xbf16> to vector<32x32xbf16>
    %100 = arith.truncf %97 : vector<16x32xf32> to vector<16x32xbf16>
    %cst_58 = arith.constant dense<0.000000e+00> : vector<16x32xf32>
    %101 = tpu.matmul %100, %99, %cst_58 {dimension_numbers = #tpu.dot_dimension_numbers<[1], [0], [0], [1], [0, 0, 1, 1], [], []>} : vector<16x32xbf16>, vector<32x32xbf16>, vector<16x32xf32> -> vector<16x32xf32>
    %c3_59 = arith.constant 3 : index
    %c0_60 = arith.constant 0 : index
    %c0_61 = arith.constant 0 : index
    %102 = vector.load %arg4[%c3_59, %c0_60, %c0_61] : memref<7x1x32xf32, #tpu.memory_space<vmem>>, vector<1x1x32xf32>
    %103 = vector.shape_cast %102 : vector<1x1x32xf32> to vector<1x32xf32>
    %104 = vector.broadcast %103 : vector<1x32xf32> to vector<16x32xf32>
    %105 = arith.addf %101, %104 : vector<16x32xf32>
    %cst_62 = arith.constant 0.000000e+00 : f32
    %106 = vector.broadcast %cst_62 : f32 to vector<16x32xf32>
    %107 = arith.maximumf %105, %106 : vector<16x32xf32>
    %c4 = arith.constant 4 : index
    %c0_63 = arith.constant 0 : index
    %c0_64 = arith.constant 0 : index
    %108 = vector.load %arg3[%c4, %c0_63, %c0_64] : memref<7x32x32xbf16, #tpu.memory_space<vmem>>, vector<1x32x32xbf16>
    %109 = vector.shape_cast %108 : vector<1x32x32xbf16> to vector<32x32xbf16>
    %110 = arith.truncf %107 : vector<16x32xf32> to vector<16x32xbf16>
    %cst_65 = arith.constant dense<0.000000e+00> : vector<16x32xf32>
    %111 = tpu.matmul %110, %109, %cst_65 {dimension_numbers = #tpu.dot_dimension_numbers<[1], [0], [0], [1], [0, 0, 1, 1], [], []>} : vector<16x32xbf16>, vector<32x32xbf16>, vector<16x32xf32> -> vector<16x32xf32>
    %c4_66 = arith.constant 4 : index
    %c0_67 = arith.constant 0 : index
    %c0_68 = arith.constant 0 : index
    %112 = vector.load %arg4[%c4_66, %c0_67, %c0_68] : memref<7x1x32xf32, #tpu.memory_space<vmem>>, vector<1x1x32xf32>
    %113 = vector.shape_cast %112 : vector<1x1x32xf32> to vector<1x32xf32>
    %114 = vector.broadcast %113 : vector<1x32xf32> to vector<16x32xf32>
    %115 = arith.addf %111, %114 : vector<16x32xf32>
    %cst_69 = arith.constant 0.000000e+00 : f32
    %116 = vector.broadcast %cst_69 : f32 to vector<16x32xf32>
    %117 = arith.maximumf %115, %116 : vector<16x32xf32>
    %118 = arith.addf %117, %97 : vector<16x32xf32>
    %c5 = arith.constant 5 : index
    %c0_70 = arith.constant 0 : index
    %c0_71 = arith.constant 0 : index
    %119 = vector.load %arg3[%c5, %c0_70, %c0_71] : memref<7x32x32xbf16, #tpu.memory_space<vmem>>, vector<1x32x32xbf16>
    %120 = vector.shape_cast %119 : vector<1x32x32xbf16> to vector<32x32xbf16>
    %121 = arith.truncf %118 : vector<16x32xf32> to vector<16x32xbf16>
    %cst_72 = arith.constant dense<0.000000e+00> : vector<16x32xf32>
    %122 = tpu.matmul %121, %120, %cst_72 {dimension_numbers = #tpu.dot_dimension_numbers<[1], [0], [0], [1], [0, 0, 1, 1], [], []>} : vector<16x32xbf16>, vector<32x32xbf16>, vector<16x32xf32> -> vector<16x32xf32>
    %c5_73 = arith.constant 5 : index
    %c0_74 = arith.constant 0 : index
    %c0_75 = arith.constant 0 : index
    %123 = vector.load %arg4[%c5_73, %c0_74, %c0_75] : memref<7x1x32xf32, #tpu.memory_space<vmem>>, vector<1x1x32xf32>
    %124 = vector.shape_cast %123 : vector<1x1x32xf32> to vector<1x32xf32>
    %125 = vector.broadcast %124 : vector<1x32xf32> to vector<16x32xf32>
    %126 = arith.addf %122, %125 : vector<16x32xf32>
    %cst_76 = arith.constant 0.000000e+00 : f32
    %127 = vector.broadcast %cst_76 : f32 to vector<16x32xf32>
    %128 = arith.maximumf %126, %127 : vector<16x32xf32>
    %c6 = arith.constant 6 : index
    %c0_77 = arith.constant 0 : index
    %c0_78 = arith.constant 0 : index
    %129 = vector.load %arg3[%c6, %c0_77, %c0_78] : memref<7x32x32xbf16, #tpu.memory_space<vmem>>, vector<1x32x32xbf16>
    %130 = vector.shape_cast %129 : vector<1x32x32xbf16> to vector<32x32xbf16>
    %131 = arith.truncf %128 : vector<16x32xf32> to vector<16x32xbf16>
    %cst_79 = arith.constant dense<0.000000e+00> : vector<16x32xf32>
    %132 = tpu.matmul %131, %130, %cst_79 {dimension_numbers = #tpu.dot_dimension_numbers<[1], [0], [0], [1], [0, 0, 1, 1], [], []>} : vector<16x32xbf16>, vector<32x32xbf16>, vector<16x32xf32> -> vector<16x32xf32>
    %c6_80 = arith.constant 6 : index
    %c0_81 = arith.constant 0 : index
    %c0_82 = arith.constant 0 : index
    %133 = vector.load %arg4[%c6_80, %c0_81, %c0_82] : memref<7x1x32xf32, #tpu.memory_space<vmem>>, vector<1x1x32xf32>
    %134 = vector.shape_cast %133 : vector<1x1x32xf32> to vector<1x32xf32>
    %135 = vector.broadcast %134 : vector<1x32xf32> to vector<16x32xf32>
    %136 = arith.addf %132, %135 : vector<16x32xf32>
    %cst_83 = arith.constant 0.000000e+00 : f32
    %137 = vector.broadcast %cst_83 : f32 to vector<16x32xf32>
    %138 = arith.maximumf %136, %137 : vector<16x32xf32>
    %139 = arith.addf %138, %118 : vector<16x32xf32>
    %140 = arith.extf %2 : vector<16x32xbf16> to vector<16x32xf32>
    %141 = arith.addf %139, %140 : vector<16x32xf32>
    %c0_84 = arith.constant 0 : index
    %c0_85 = arith.constant 0 : index
    %142 = vector.load %arg14[%c0_84, %c0_85] : memref<16x32xf32, #tpu.memory_space<vmem>>, vector<16x32xf32>
    tpu.vector_store %arg14[%c0_84, %c0_85], %141 {strides = array<i32>} : memref<16x32xf32, #tpu.memory_space<vmem>>, vector<16x32xf32>,
    return
  }
  func.func @transform_0(%arg0: i32) -> (i32, i32) {
    %c0_i32 = arith.constant 0 : i32
    %c0_i32_0 = arith.constant 0 : i32
    %c0_i32_1 = arith.constant 0 : i32
    return %c0_i32, %c0_i32_0 : i32, i32
  }
  func.func @transform_1(%arg0: i32) -> (i32, i32) {
    %c0_i32 = arith.constant 0 : i32
    %c0_i32_0 = arith.constant 0 : i32
    %c0_i32_1 = arith.constant 0 : i32
    return %c0_i32, %c0_i32_0 : i32, i32
  }
  func.func @transform_2(%arg0: i32) -> (i32, i32, i32) {
    %c0_i32 = arith.constant 0 : i32
    %c0_i32_0 = arith.constant 0 : i32
    %c0_i32_1 = arith.constant 0 : i32
    %c0_i32_2 = arith.constant 0 : i32
    return %c0_i32, %c0_i32_0, %c0_i32_1 : i32, i32, i32
  }
  func.func @transform_3(%arg0: i32) -> (i32, i32, i32) {
    %c0_i32 = arith.constant 0 : i32
    %c0_i32_0 = arith.constant 0 : i32
    %c0_i32_1 = arith.constant 0 : i32
    %c0_i32_2 = arith.constant 0 : i32
    return %c0_i32, %c0_i32_0, %c0_i32_1 : i32, i32, i32
  }
  func.func @transform_4(%arg0: i32) -> (i32, i32) {
    %c0_i32 = arith.constant 0 : i32
    %c0_i32_0 = arith.constant 0 : i32
    %c0_i32_1 = arith.constant 0 : i32
    return %c0_i32, %c0_i32_0 : i32, i32
  }
  func.func @transform_5(%arg0: i32) -> (i32, i32) {
    %c0_i32 = arith.constant 0 : i32
    %c0_i32_0 = arith.constant 0 : i32
    %c0_i32_1 = arith.constant 0 : i32
    return %c0_i32, %c0_i32_0 : i32, i32
  }
  func.func @transform_6(%arg0: i32) -> (i32, i32) {
    %c0_i32 = arith.constant 0 : i32
    %c0_i32_0 = arith.constant 0 : i32
    %c0_i32_1 = arith.constant 0 : i32
    return %c0_i32, %c0_i32_0 : i32, i32
  }
  func.func @transform_7(%arg0: i32) -> (i32, i32) {
    %c0_i32 = arith.constant 0 : i32
    %c0_i32_0 = arith.constant 0 : i32
    %c0_i32_1 = arith.constant 0 : i32
    return %c0_i32, %c0_i32_0 : i32, i32
  }
  func.func @transform_8(%arg0: i32) -> (i32, i32) {
    %c0_i32 = arith.constant 0 : i32
    %c0_i32_0 = arith.constant 0 : i32
    %c0_i32_1 = arith.constant 0 : i32
    return %c0_i32, %c0_i32_0 : i32, i32
  }
  func.func @transform_9(%arg0: i32) -> (i32, i32) {
    %c0_i32 = arith.constant 0 : i32
    %c0_i32_0 = arith.constant 0 : i32
    %c0_i32_1 = arith.constant 0 : i32
    return %c0_i32, %c0_i32_0 : i32, i32
  }
  func.func @transform_10(%arg0: i32) -> (i32, i32) {
    %c0_i32 = arith.constant 0 : i32
    %c0_i32_0 = arith.constant 0 : i32
    %c0_i32_1 = arith.constant 0 : i32
    return %c0_i32, %c0_i32_0 : i32, i32
  }
  func.func @transform_11(%arg0: i32) -> (i32, i32) {
    %c0_i32 = arith.constant 0 : i32
    %c0_i32_0 = arith.constant 0 : i32
    %c0_i32_1 = arith.constant 0 : i32
    return %c0_i32, %c0_i32_0 : i32, i32
  }
  func.func @transform_12(%arg0: i32) -> (i32, i32) {
    %c0_i32 = arith.constant 0 : i32
    %c0_i32_0 = arith.constant 0 : i32
    %c0_i32_1 = arith.constant 0 : i32
    return %c0_i32, %c0_i32_0 : i32, i32
  }
  func.func @transform_13(%arg0: i32) -> (i32, i32) {
    %c0_i32 = arith.constant 0 : i32
    %c0_i32_0 = arith.constant 0 : i32
    %c0_i32_1 = arith.constant 0 : i32
    return %c0_i32, %c0_i32_0 : i32, i32
  }
}

</mosaic_0001>

<bundles_post_ra>
// kernel: tpu_custom_call.1
= control target key start
LH: loop header
LB: loop body
LE: loop exit
PB: predicated region body
PF: predicated region fallthrough
CT: control target
= control target key end

     0   :  { %19 = vsyncpa [#allocation3], 0  ;;  %s1417_s0 = inlined_call_operand.hbm [shape: bf16[24,32], index: 0, kind: input, shape index: {}]   ;;  %s1418_s1 = inlined_call_operand.hbm [shape: bf16[1,32], index: 1, kind: input, shape index: {}]   ;;  %s1419_s2 = inlined_call_operand.hbm [shape: bf16[7,32,32], index: 2, kind: input, shape index: {}]   ;;  %s1420_s3 = inlined_call_operand.hbm [shape: f32[7,1,32], index: 3, kind: input, shape index: {}]   ;;  %s1421_s4 = inlined_call_operand.hbm [shape: bf16[32,32], index: 4, kind: input, shape index: {}]   ;;  %s1422_s5 = inlined_call_operand.vmem [shape: f32[1,32], index: 5, kind: input, shape index: {}]   ;;  %s1423_s6 = inlined_call_operand.hbm [shape: bf16[32,32], index: 6, kind: input, shape index: {}]   ;;  %s1424_s7 = inlined_call_operand.vmem [shape: f32[1,32], index: 7, kind: input, shape index: {}]   ;;  %s1425_s8 = inlined_call_operand.hbm [shape: bf16[32,32], index: 8, kind: input, shape index: {}]   ;;  %s1426_s9 = inlined_call_operand.vmem [shape: f32[1,32], index: 9, kind: input, shape index: {}]   ;;  %s1427_s10 = inlined_call_operand.hbm [shape: f32[1,8], index: 10, kind: output, shape index: {0}]   ;;  %s1428_s11 = inlined_call_operand.hbm [shape: f32[8,24], index: 11, kind: output, shape index: {1}]   ;;  %s1429_s12 = inlined_call_operand.hbm [shape: f32[8,24], index: 12, kind: output, shape index: {2}]   ;;  %s1430_s13 = inlined_call_operand.hbm [shape: f32[16,32], index: 13, kind: output, shape index: {3}]  }
   0x1   :  { %20 = vsyncpa [#allocation6], 0 }
   0x2   :  { %21 = vsyncpa [#allocation9], 0 }
   0x3   :  { %22 = vsyncpa [#allocation12], 0 }
   0x4   :  { %23 = vsyncpa [#allocation4], 0 }
   0x5   :  { %24 = vsyncpa [#allocation16], 0  ;;  %s44_s27 = sshll.u32 %s1418_s1, 4  ;;  %s45_s27 = int_to_ptr.hbm [resolvable:$true] %s44_s27 }
   0x6   :  { %25 = vsyncpa [#allocation19], 0  ;;  %s1227_s28 = smov [#allocation5]   ;;  %s67_s15 = sshll.u32 %s1420_s3, 4  ;;  %s68_s15 = int_to_ptr.hbm [resolvable:$true] %s67_s15 }
   0x7   :  { %s46_s29 = sshll.u32 %s1227_s28, 4  ;;  %s1228_s16 = smov [#allocation8]   ;;  %s47_s29 = int_to_ptr.vmem [resolvable:$true] %s46_s29 }
   0x8   :  { %49 = dma.hbm_to_vmem [thread:$0]  %s45_s27, 16, %s47_s29, [#allocation6]  }
   0x9   :  { %s69_s17 = sshll.u32 %s1228_s16, 4  ;;  %s1229_s18 = smov 16   ;;  %s70_s17 = int_to_ptr.vmem [resolvable:$true] %s69_s17 }
   0xa   :  { %s1230_s19 = smov 1   ;;  %s95_s1 = sshll.u32 %s1423_s6, 4  ;;  %s96_s1 = int_to_ptr.hbm [resolvable:$true] %s95_s1 }
   0xb   :  { %75 = dma.hbm_to_vmem [thread:$0]  %s68_s15, 112, %s70_s17, [#allocation9], %s1229_s18, %s1229_s18, %s1230_s19  }
   0xc   :  { %s1231_s22 = smov [#allocation11]   ;;  %s30_s3 = sshll.u32 %s1417_s0, 4  ;;  %s31_s3 = int_to_ptr.hbm [resolvable:$true] %s30_s3 }
   0xd   :  { %s97_s23 = sshll.u32 %s1231_s22, 4  ;;  %s1232_s26 = smov 64   ;;  %s98_s23 = int_to_ptr.vmem [resolvable:$true] %s97_s23 }
   0xe   :  { %s1233_s27 = smov 4   ;;  %s1234_s28 = smov [#allocation2]  }
   0xf   :  { %103 = dma.hbm_to_vmem [thread:$0]  %s96_s1, 256, %s98_s23, [#allocation12], %s1232_s26, %s1232_s26, %s1233_s27  }
  0x10   :  { %s32_s29 = sshll.u32 %s1234_s28, 4  ;;  %s54_s15 = sshll.u32 %s1419_s2, 4  ;;  %s33_s29 = int_to_ptr.vmem [resolvable:$true] %s32_s29  ;;  %s55_s15 = int_to_ptr.hbm [resolvable:$true] %s54_s15 }
  0x11   :  { %38 = dma.hbm_to_vmem [thread:$0]  %s31_s3, 192, %s33_s29, [#allocation3], %s1232_s26, %s1232_s26, %s1233_s27  }
  0x12   :  { %s80_s17 = sshll.u32 %s1421_s4, 4  ;;  %s1235_s18 = smov [#allocation7]   ;;  %s81_s17 = int_to_ptr.hbm [resolvable:$true] %s80_s17 }
  0x13   :  { %s56_s19 = sshll.u32 %s1235_s18, 4  ;;  %s1236_s0 = smov [#allocation10]   ;;  %s57_s19 = int_to_ptr.vmem [resolvable:$true] %s56_s19 }
  0x14   :  { %62 = dma.hbm_to_vmem [thread:$0]  %s55_s15, 1792, %s57_s19, [#allocation6], %s1232_s26, %s1232_s26, %s1233_s27  }
  0x15   :  { %s82_s20 = sshll.u32 %s1236_s0, 4  ;;  %s110_s22 = sshll.u32 %s1425_s8, 4  ;;  %s83_s20 = int_to_ptr.vmem [resolvable:$true] %s82_s20  ;;  %s111_s22 = int_to_ptr.hbm [resolvable:$true] %s110_s22 }
  0x16   :  { %88 = dma.hbm_to_vmem [thread:$0]  %s81_s17, 256, %s83_s20, [#allocation9], %s1232_s26, %s1232_s26, %s1233_s27  }
  0x17   :  { %s1237_s2 = smov [#allocation13]  }
  0x18   :  { %s112_s23 = sshll.u32 %s1237_s2, 4  ;;  %s113_s23 = int_to_ptr.vmem [resolvable:$true] %s112_s23 }
  0x19   :  { %118 = dma.hbm_to_vmem [thread:$0]  %s111_s22, 256, %s113_s23, [#allocation12], %s1232_s26, %s1232_s26, %s1233_s27  }
  0x1a   :  { %1213 = dma.done.wait [#allocation3], 192  }
  0x1b   :  { %1214 = vsyncadd [#allocation3], 4294967104 }
  0x1c   :  { %1215 = dma.done.wait [#allocation6], 1808  }
  0x1d   :  { %1216 = vsyncadd [#allocation6], 4294965488 }
  0x1e   :  { %1217 = dma.done.wait [#allocation9], 368  }
  0x1f   :  { %1218 = vsyncadd [#allocation9], 4294966928 }
  0x20   :  { %1219 = dma.done.wait [#allocation12], 512  }
  0x21   :  { %1220 = vsyncadd [#allocation12], 4294966784  ;;  %v893_v0 = vld [vmem:[#allocation11 + $0x8] sm:$0xff]  ;;  %v895_v1 = vld [vmem:[#allocation13 + $0x8] sm:$0xff]  ;;  %vm154_vm0 = vcmask 261120   ;;  %vm174_vm1 = vcmask 57344  }
  0x22   :  { %v892_v2 = vld [vmem:[#allocation11] sm:$0xff]  ;;  %v150_v3 = vld [vmem:[#allocation2] sm:$0xf]  ;;  %v151_v4 = vld [vmem:[#allocation2 + $0x4] sm:$0xf]  ;;  %265 = vmatpush.bf16.msra.mxu2 %v893_v0  ;;  %311 = vmatpush.bf16.msra.mxu3 %v895_v1  ;;  %vm354_vm2 = vcmask 195584  }
  0x23   :  { %v894_v5 = vld [vmem:[#allocation13] sm:$0xff]  ;;  %v236_v6 = vunpack.c.l.b16 %v150_v3  ;;  %v237_v7 = vunpack.c.l.b16 %v151_v4  ;;  %v891_v9 = vld [vmem:[#allocation10 + $0x8] sm:$0xff]  ;;  %v159_v10 = vsel %vm154_vm0, %v150_v3, 0  ;;  %v928_v26 = vld [vmem:[%s1426_s9] ss:$0 sm:$0xff]  ;;  %v223_v41 = vunpack.c.l.bf16 %v150_v3  ;;  %s744_s28 = sshll.u32 %s1428_s11, 4  ;;  %s745_s28 = int_to_ptr.hbm [resolvable:$true] %s744_s28 }
  0x24   :  { %v152_v8 = vld [vmem:[#allocation2 + $0x8] sm:$0xf]  ;;  %168 = vmatpush.bf16.xpose.msra.mxu0 %v159_v10  ;;  %215 = vmatpush.bf16.msra.mxu1 %v891_v9  ;;  %v153_v15 = vld [vmem:[#allocation5] sm:$0x1]  ;;  %v927_v27 = vld [vmem:[%s1424_s7] ss:$0 sm:$0xff]  ;;  %v1356_v43 = vunpack.c.l.bf16 %v151_v4 }
  0x25   :  { %v238_v11 = vunpack.c.l.b16 %v152_v8  ;;  %v890_v12 = vld [vmem:[#allocation10] sm:$0xff]  ;;  %v239_v13 = vpack.c.b16 %v237_v7, %v236_v6  ;;  %v1354_v35 = vunpack.c.l.bf16 %v152_v8  ;;  %v929_v44 = vld [vmem:[%s1422_s5] ss:$0 sm:$0xff]  ;;  %v897_v63 = vld [vmem:[#allocation7 + $0x8] sm:$0xff]  ;;  %s1238_s5 = smov [#allocation15]   ;;  %s733_s14 = sshll.u32 %s1427_s10, 4  ;;  %s734_s14 = int_to_ptr.hbm [resolvable:$true] %s733_s14 }
  0x26   :  { %266 = vmatpush.bf16.msra.mxu2 %v892_v2  ;;  %312 = vmatpush.bf16.msra.mxu3 %v894_v5  ;;  %v896_v2 = vld [vmem:[#allocation7] sm:$0xff]  ;;  %v899_v4 = vld [vmem:[#allocation7 + $0x18] sm:$0xff]  ;;  %v898_v5 = vld [vmem:[#allocation7 + $0x10] sm:$0xff]  ;;  %s742_s3 = sshll.u32 %s1238_s5, 4  ;;  %s1239_s15 = smov [#allocation14]   ;;  %s743_s3 = int_to_ptr.vmem [resolvable:$true] %s742_s3 }
  0x27   :  { %v1336_v14 = vpack.c.b16 %v238_v11, %v237_v7  ;;  %v240_v16 = vpack.c.b16 %v238_v11, %v238_v11  ;;  %s731_s6 = sshll.u32 %s1239_s15, 4  ;;  %s1240_s16 = smov [#allocation17]   ;;  %s732_s6 = int_to_ptr.vmem [resolvable:$true] %s731_s6 }
  0x28   :  { %216 = vmatpush.bf16.msra.mxu1 %v890_v12  ;;  %s753_s17 = sshll.u32 %s1240_s16, 4  ;;  %s755_s0 = sshll.u32 %s1429_s12, 4  ;;  %s754_s17 = int_to_ptr.vmem [resolvable:$true] %s753_s17  ;;  %s756_s0 = int_to_ptr.hbm [resolvable:$true] %s755_s0 }
  0x29   :  { %813 = vmatmul.msk.bf16.vlgmr.msra.gmra.mxu2 %vm154_vm0, %v239_v13  ;;  %823 = vmatmul.msk.bf16.vlgmr.msra.gmra.mxu3 %vm154_vm0, %v239_v13  ;;  %v930_v13 = vld [vmem:[#allocation8] ss:$0 sm:$0xff]  ;;  %s1241_s10 = smov [#allocation18]   ;;  %s765_s12 = sshll.u32 %s1430_s13, 4  ;;  %s766_s12 = int_to_ptr.hbm [resolvable:$true] %s765_s12 }
  0x2a   :  { %s763_s11 = sshll.u32 %s1241_s10, 4  ;;  %s1242_s1 = smov 128   ;;  %s764_s11 = int_to_ptr.vmem [resolvable:$true] %s763_s11 }
  0x2b   :  { %795 = vmatmul.msk.bf16.vlgmr.msra.gmra.mxu0 %vm154_vm0, %v153_v15  ;;  %804 = vmatmul.msk.bf16.vlgmr.msra.gmra.mxu1 %vm154_vm0, %v150_v3  ;;  %s1243_s22 = smov 8  }
  0x39   :  { %814 = vmatmul.msk.bf16.gmra.mxu2 %vm154_vm0, %v240_v16  ;;  %824 = vmatmul.msk.bf16.gmra.mxu3 %vm154_vm0, %v240_v16 }
  0xa8   :  { %v1344_v17 = vpop.f32.mrf.mxu0  ;;  %v218_v18 = vpop.f32.mrf.mxu1 }
  0xa9   :  { %v175_v21 = vsel %vm174_vm1, %v1344_v17, -inf  ;;  %v219_v55 = vadd.f32 %v929_v44, %v218_v18 }
  0xaa   :  { %176 = vmax.xlane.f32.xlu1 %v175_v21 }
  0xab   :  { %v222_v60 = vmax.f32 %v219_v55, 0.0 }
  0xac   :  { %v268_v19 = vpop.f32.mrf.mxu2  ;;  %v314_v20 = vpop.f32.mrf.mxu3 }
  0xad   :  { %v315_v28 = vadd.f32 %v928_v26, %v314_v20  ;;  %v269_v36 = vadd.f32 %v927_v27, %v268_v19  ;;  %v224_v0 = vadd.f32 %v223_v41, %v222_v60  ;;  %v901_v19 = vld [vmem:[#allocation7 + $0x28] sm:$0xff] }
  0xae   :  { %538 = vmatpush.bf16.msrb.mxu2 %v901_v19 }
  0xaf   :  { %v323_v37 = vmax.f32 %v315_v28, 0.0  ;;  %v277_v47 = vmax.f32 %v269_v36, 0.0  ;;  %v329_v3 = vpack.c.bf16 %v224_v0, %v224_v0 }
  0xb0   :  { %v172_v22 = vpop.f32.mrf.mxu0  ;;  %v220_v23 = vpop.f32.mrf.mxu1 }
  0xb1   :  { %v326_v48 = vadd.f32 %v323_v37, %v223_v41  ;;  %v282_v58 = vadd.f32 %v277_v47, %v223_v41 }
  0xb4   :  { %v270_v24 = vpop.f32.mrf.mxu2  ;;  %v316_v25 = vpop.f32.mrf.mxu3 }
  0xb5   :  { %v317_v29 = vadd.f32 %v928_v26, %v316_v25  ;;  %v271_v32 = vadd.f32 %v927_v27, %v270_v24  ;;  %v900_v25 = vld [vmem:[#allocation7 + $0x20] sm:$0xff] }
  0xb6   :  { %539 = vmatpush.bf16.msrb.mxu2 %v900_v25 }
  0xb7   :  { %v324_v38 = vmax.f32 %v317_v29, 0.0  ;;  %v278_v42 = vmax.f32 %v271_v32, 0.0 }
  0xb9   :  { %v327_v49 = vadd.f32 %v324_v38, %v1356_v43  ;;  %v283_v54 = vadd.f32 %v1356_v43, %v278_v42  ;;  %v931_v38 = vld [vmem:[#allocation8 + $0x1] ss:$0 sm:$0xff] }
  0xbb   :  { %v380_v59 = vpack.c.bf16 %v327_v49, %v326_v48  ;;  %v330_v61 = vpack.c.bf16 %v283_v54, %v282_v58 }
  0xbc   :  { %v273_v30 = vpop.f32.mrf.mxu2  ;;  %v319_v31 = vpop.f32.mrf.mxu3 }
  0xbd   :  { %v274_v33 = vadd.f32 %v927_v27, %v273_v30  ;;  %v320_v34 = vadd.f32 %v928_v26, %v319_v31  ;;  %v383_v62 = vsel %vm154_vm0, %v380_v59, 0  ;;  %v336_v1 = vsel %vm154_vm0, %v330_v61, 0 }
  0xbf   :  { %v279_v39 = vmax.f32 %v274_v33, 0.0  ;;  %v325_v40 = vmax.f32 %v320_v34, 0.0 }
  0xc1   :  { %v284_v45 = vadd.f32 %v1354_v35, %v279_v39  ;;  %v328_v46 = vadd.f32 %v325_v40, %v1354_v35 }
  0xc3   :  { %v331_v50 = vpack.c.bf16 %v284_v45, %v284_v45  ;;  %v381_v51 = vpack.c.bf16 %v328_v46, %v328_v46  ;;  %v903_v46 = vld [vmem:[#allocation7 + $0x38] sm:$0xff] }
  0xc4   :  { %v275_v52 = vpop.f32.mrf.mxu2  ;;  %v321_v53 = vpop.f32.mrf.mxu3  ;;  %582 = vmatpush.bf16.msrb.mxu3 %v903_v46 }
  0xc5   :  { %v339_v56 = vsel %vm154_vm0, %v331_v50, 0  ;;  %v386_v57 = vsel %vm154_vm0, %v381_v51, 0 }
  0xc6   :  { %347 = vmatpush.bf16.xpose.msrb.mxu0 %v339_v56  ;;  %394 = vmatpush.bf16.xpose.msrb.mxu1 %v386_v57 }
  0xce   :  { %348 = vmatpush.bf16.xpose.msrb.mxu0 %v336_v1  ;;  %395 = vmatpush.bf16.xpose.msrb.mxu1 %v383_v62 }
  0xd5   :  { %825 = vmatmul.msk.bf16.vlgmr.msrb.gmra.mxu0 %vm154_vm0, %v329_v3  ;;  %826 = vmatmul.msk.bf16.vlgmr.msrb.gmra.mxu1 %vm154_vm0, %v329_v3 }
  0xd6   :  { %456 = vmatpush.bf16.msra.mxu0 %v897_v63  ;;  %496 = vmatpush.bf16.msra.mxu1 %v899_v4 }
  0xda   :  { %457 = vmatpush.bf16.msra.mxu0 %v896_v2  ;;  %497 = vmatpush.bf16.msra.mxu1 %v898_v5 }
  0xe5   :  { %835 = vmatmul.msk.bf16.vlgmr.msra.gmra.mxu0 %vm154_vm0, %v1336_v14 }
 0x11d   :  { %v1382_v23 = vpop.xlane.xlu1 %176 }
 0x11e   :  { %v178_v28 = vsub.f32 %v1344_v17, %v1382_v23 }
 0x120   :  { %v179_v31 = vmul.f32 1.442695, %v178_v28  ;;  %v933_v28 = vld [vmem:[#allocation8 + $0x3] ss:$0 sm:$0xff] }
 0x152   :  { %v350_v6 = vpop.f32.mrf.mxu0  ;;  %v397_v7 = vpop.f32.mrf.mxu1 }
 0x153   :  { %v355_v8 = vsel %vm354_vm2, %v350_v6, -inf  ;;  %v401_v11 = vsel %vm354_vm2, %v397_v7, -inf }
 0x154   :  { %356 = vmax.xlane.f32.xlu0 %v355_v8 }
 0x15a   :  { %v352_v9 = vpop.f32.mrf.mxu0  ;;  %v399_v10 = vpop.f32.mrf.mxu1 }
 0x15c   :  { %402 = vmax.xlane.f32.xlu0 %v401_v11 }
 0x162   :  { %v459_v12 = vpop.f32.mrf.mxu0 }
 0x163   :  { %v1375_v16 = vadd.f32 %v930_v13, %v459_v12  ;;  %v902_v12 = vld [vmem:[#allocation7 + $0x30] sm:$0xff] }
 0x164   :  { %583 = vmatpush.bf16.msrb.mxu3 %v902_v12 }
 0x16a   :  { %v461_v15 = vpop.f32.mrf.mxu0 }
 0x16b   :  { %v1377_v14 = vadd.f32 %v930_v13, %v461_v15  ;;  %v932_v15 = vld [vmem:[#allocation8 + $0x2] ss:$0 sm:$0xff] }
 0x16d   :  { %v469_v18 = vpack.c.bf16 %v1377_v14, %v1375_v16 }
 0x16f   :  { %844 = vmatmul.msk.bf16.vlgmr.msra.gmra.mxu1 %vm154_vm0, %v469_v18 }
 0x1c7   :  { %v357_v20 = vpop.xlane.xlu0 %356 }
 0x1c8   :  { %v358_v21 = vsub.f32 %v350_v6, %v357_v20 }
 0x1ca   :  { %v359_v22 = vmul.f32 1.442695, %v358_v21 }
 0x1cc   :  { %937 = vpow2.f32 %v359_v22 }
 0x1cf   :  { %v403_v24 = vpop.xlane.xlu0 %402 }
 0x1d0   :  { %v404_v26 = vsub.f32 %v397_v7, %v403_v24 }
 0x1d2   :  { %v938_v27 = vpop.eup %937  ;;  %v405_v29 = vmul.f32 1.442695, %v404_v26  ;;  %v904_v26 = vld [vmem:[#allocation7 + $0x40] sm:$0xff] }
 0x1d3   :  { %v361_v30 = vsel %vm354_vm2, %v938_v27, 0.0 }
 0x1d4   :  { %939 = vpow2.f32 %v405_v29  ;;  %362 = vadd.xlane.f32.xlu1 %v361_v30 }
 0x1d5   :  { %941 = vpow2.f32 %v179_v31 }
 0x1da   :  { %v940_v32 = vpop.eup %939 }
 0x1db   :  { %v407_v33 = vsel %vm354_vm2, %v940_v32, 0.0  ;;  %v942_v34 = vpop.eup %941 }
 0x1dc   :  { %408 = vadd.xlane.f32.xlu2 %v407_v33  ;;  %v181_v36 = vsel %vm174_vm1, %v942_v34, 0.0 }
 0x1e4   :  { %182 = vadd.xlane.f32.xlu2 %v181_v36 }
 0x1ec   :  { %v499_v37 = vpop.f32.mrf.mxu1 }
 0x1ed   :  { %v500_v39 = vadd.f32 %v931_v38, %v499_v37  ;;  %v934_v37 = vld [vmem:[#allocation8 + $0x4] ss:$0 sm:$0xff] }
 0x1ef   :  { %v504_v42 = vmax.f32 %v500_v39, 0.0 }
 0x1f4   :  { %v501_v40 = vpop.f32.mrf.mxu1 }
 0x1f5   :  { %v502_v41 = vadd.f32 %v931_v38, %v501_v40 }
 0x1f7   :  { %v505_v44 = vmax.f32 %v502_v41, 0.0 }
 0x1f9   :  { %v511_v45 = vpack.c.bf16 %v505_v44, %v504_v42 }
 0x1fb   :  { %853 = vmatmul.msk.bf16.vlgmr.msrb.gmra.mxu2 %vm154_vm0, %v511_v45 }
 0x247   :  { %v363_v47 = vpop.xlane.xlu1 %362 }
 0x248   :  { %943 = vrcp.f32 %v363_v47  ;;  %v375_v52 = vand.u32 2147483648, %v363_v47  ;;  %v373_v54 = vand.u32 2147483647, %v363_v47  ;;  %vm369_vm4 = vweird.f32 %v363_v47 }
 0x24a   :  { %v376_v57 = vor.u32 1.1754944e-38, %v375_v52  ;;  %vm374_vm6 = vcmp.eq.f32.partialorder %v373_v54, 8.507059e+37 }
 0x24e   :  { %v944_v48 = vpop.eup %943 }
 0x24f   :  { %v365_v49 = vmul.f32 %v944_v48, %v363_v47  ;;  %v409_v50 = vpop.xlane.xlu2 %408  ;;  %vm370_vm3 = vweird.f32 %v944_v48  ;;  %v909_v47 = vld [vmem:[#allocation7 + $0x68] sm:$0xff] }
 0x250   :  { %945 = vrcp.f32 %v409_v50  ;;  %vm371_vm5 = vmor %vm369_vm4, %vm370_vm3  ;;  %v421_v0 = vand.u32 2147483648, %v409_v50  ;;  %v419_v2 = vand.u32 2147483647, %v409_v50  ;;  %vm415_vm8 = vweird.f32 %v409_v50  ;;  %710 = vmatpush.bf16.msra.mxu2 %v909_v47 }
 0x251   :  { %v366_v51 = vsub.f32 1.0, %v365_v49 }
 0x252   :  { %v422_v5 = vor.u32 1.1754944e-38, %v421_v0  ;;  %vm420_vm10 = vcmp.eq.f32.partialorder %v419_v2, 8.507059e+37 }
 0x253   :  { %v367_v53 = vmul.f32 %v944_v48, %v366_v51 }
 0x255   :  { %v368_v55 = vadd.f32 %v944_v48, %v367_v53 }
 0x256   :  { %v946_v56 = vpop.eup %945 }
 0x257   :  { %v372_v58 = vsel %vm371_vm5, %v944_v48, %v368_v55  ;;  %v411_v59 = vmul.f32 %v946_v56, %v409_v50  ;;  %v183_v60 = vpop.xlane.xlu2 %182  ;;  %vm416_vm7 = vweird.f32 %v946_v56  ;;  %v908_v48 = vld [vmem:[#allocation7 + $0x60] sm:$0xff]  ;;  %v935_v50 = vld [vmem:[#allocation8 + $0x5] ss:$0 sm:$0xff] }
 0x258   :  { %v377_v61 = vsel %vm374_vm6, %v376_v57, %v372_v58  ;;  %947 = vlog2.f32 %v183_v60  ;;  %vm417_vm9 = vmor %vm415_vm8, %vm416_vm7  ;;  %711 = vmatpush.bf16.msra.mxu2 %v908_v48  ;;  %v936_v57 = vld [vmem:[#allocation8 + $0x6] ss:$0 sm:$0xff] }
 0x259   :  { %v412_v62 = vsub.f32 1.0, %v411_v59  ;;  %v378_v63 = vmul.f32 %v938_v27, %v377_v61 }
 0x25b   :  { %v413_v1 = vmul.f32 %v946_v56, %v412_v62  ;;  %379 = vst.msk [vmem:[#allocation15] sm:$0xff] %vm354_vm2, %v378_v63 }
 0x25c   :  { %747 = dma.vmem_to_hbm [thread:$0]  %s743_s3, 128, %s745_s28, [#allocation16]  }
 0x25d   :  { %v414_v3 = vadd.f32 %v946_v56, %v413_v1 }
 0x25e   :  { %v948_v4 = vpop.eup %947 }
 0x25f   :  { %v418_v6 = vsel %vm417_vm9, %v946_v56, %v414_v3  ;;  %v185_v7 = vmul.f32 0.6931472, %v948_v4 }
 0x260   :  { %v423_v8 = vsel %vm420_vm10, %v422_v5, %v418_v6 }
 0x261   :  { %v186_v9 = vadd.f32 %v185_v7, %v1382_v23  ;;  %v424_v10 = vmul.f32 %v940_v32, %v423_v8 }
 0x263   :  { %v187_v11 = vsub.f32 %v1344_v17, %v186_v9  ;;  %425 = vst.msk [vmem:[#allocation17] sm:$0xff] %vm354_vm2, %v424_v10  ;;  %v905_v17 = vld [vmem:[#allocation7 + $0x48] sm:$0xff] }
 0x264   :  { %624 = vmatpush.bf16.msrb.mxu0 %v905_v17  ;;  %758 = dma.vmem_to_hbm [thread:$0]  %s754_s17, 128, %s756_s0, [#allocation16]  }
 0x265   :  { %188 = vst.msk [vmem:[#allocation14] sm:$0x1] %vm174_vm1, %v187_v11 }
 0x266   :  { %736 = dma.vmem_to_hbm [thread:$0]  %s732_s6, 16, %s734_s14, [#allocation4]  }
 0x268   :  { %625 = vmatpush.bf16.msrb.mxu0 %v904_v26 }
 0x27e   :  { %v541_v13 = vpop.f32.mrf.mxu2 }
 0x27f   :  { %v542_v18 = vadd.f32 %v932_v15, %v541_v13 }
 0x281   :  { %v546_v20 = vmax.f32 %v542_v18, 0.0 }
 0x283   :  { %v548_v24 = vadd.f32 %v546_v20, %v1375_v16  ;;  %v907_v16 = vld [vmem:[#allocation7 + $0x58] sm:$0xff] }
 0x284   :  { %668 = vmatpush.bf16.msrb.mxu1 %v907_v16 }
 0x286   :  { %v543_v19 = vpop.f32.mrf.mxu2 }
 0x287   :  { %v544_v21 = vadd.f32 %v932_v15, %v543_v19 }
 0x289   :  { %v547_v22 = vmax.f32 %v544_v21, 0.0 }
 0x28b   :  { %v549_v23 = vadd.f32 %v547_v22, %v1377_v14  ;;  %v906_v14 = vld [vmem:[#allocation7 + $0x50] sm:$0xff] }
 0x28c   :  { %669 = vmatpush.bf16.msrb.mxu1 %v906_v14 }
 0x28d   :  { %v555_v25 = vpack.c.bf16 %v549_v23, %v548_v24 }
 0x28f   :  { %862 = vmatmul.msk.bf16.vlgmr.msrb.gmra.mxu3 %vm154_vm0, %v555_v25 }
 0x312   :  { %v585_v27 = vpop.f32.mrf.mxu3 }
 0x313   :  { %v586_v29 = vadd.f32 %v933_v28, %v585_v27 }
 0x315   :  { %v590_v32 = vmax.f32 %v586_v29, 0.0 }
 0x31a   :  { %v587_v30 = vpop.f32.mrf.mxu3 }
 0x31b   :  { %v588_v31 = vadd.f32 %v933_v28, %v587_v30 }
 0x31d   :  { %v591_v33 = vmax.f32 %v588_v31, 0.0 }
 0x31f   :  { %v597_v34 = vpack.c.bf16 %v591_v33, %v590_v32 }
 0x321   :  { %871 = vmatmul.msk.bf16.vlgmr.msrb.gmra.mxu0 %vm154_vm0, %v597_v34 }
 0x39e   :  { %v627_v36 = vpop.f32.mrf.mxu0 }
 0x39f   :  { %v628_v38 = vadd.f32 %v934_v37, %v627_v36 }
 0x3a1   :  { %v632_v40 = vmax.f32 %v628_v38, 0.0 }
 0x3a3   :  { %v634_v44 = vadd.f32 %v632_v40, %v548_v24 }
 0x3a6   :  { %v629_v39 = vpop.f32.mrf.mxu0 }
 0x3a7   :  { %v630_v41 = vadd.f32 %v934_v37, %v629_v39 }
 0x3a9   :  { %v633_v42 = vmax.f32 %v630_v41, 0.0 }
 0x3ab   :  { %v635_v45 = vadd.f32 %v633_v42, %v549_v23 }
 0x3ad   :  { %v641_v46 = vpack.c.bf16 %v635_v45, %v634_v44 }
 0x3af   :  { %880 = vmatmul.msk.bf16.vlgmr.msrb.gmra.mxu1 %vm154_vm0, %v641_v46 }
 0x42c   :  { %v671_v49 = vpop.f32.mrf.mxu1 }
 0x42d   :  { %v672_v51 = vadd.f32 %v935_v50, %v671_v49 }
 0x42f   :  { %v676_v54 = vmax.f32 %v672_v51, 0.0 }
 0x434   :  { %v673_v52 = vpop.f32.mrf.mxu1 }
 0x435   :  { %v674_v53 = vadd.f32 %v935_v50, %v673_v52 }
 0x437   :  { %v677_v55 = vmax.f32 %v674_v53, 0.0 }
 0x439   :  { %v683_v56 = vpack.c.bf16 %v677_v55, %v676_v54 }
 0x43b   :  { %889 = vmatmul.msk.bf16.vlgmr.msra.gmra.mxu2 %vm154_vm0, %v683_v56 }
 0x4be   :  { %v713_v58 = vpop.f32.mrf.mxu2 }
 0x4bf   :  { %v714_v59 = vadd.f32 %v936_v57, %v713_v58 }
 0x4c1   :  { %v718_v60 = vmax.f32 %v714_v59, 0.0 }
 0x4c3   :  { %v720_v61 = vadd.f32 %v718_v60, %v634_v44 }
 0x4c5   :  { %v722_v62 = vadd.f32 %v720_v61, %v1356_v43 }
 0x4c6   :  { %v715_v63 = vpop.f32.mrf.mxu2 }
 0x4c7   :  { %724 = vst.msk [vmem:[#allocation18] sm:$0xff] %vm154_vm0, %v722_v62  ;;  %v716_v0 = vadd.f32 %v936_v57, %v715_v63 }
 0x4c9   :  { %v719_v1 = vmax.f32 %v716_v0, 0.0 }
 0x4cb   :  { %v721_v2 = vadd.f32 %v719_v1, %v635_v45 }
 0x4cd   :  { %v723_v3 = vadd.f32 %v721_v2, %v1354_v35 }
 0x4cf   :  { %725 = vst.msk [vmem:[#allocation18 + $0x8] sm:$0xff] %vm154_vm0, %v723_v3 }
 0x4d0   :  { %771 = dma.vmem_to_hbm [thread:$0]  %s764_s11, 256, %s766_s12, [#allocation19], %s1242_s1, %s1242_s1, %s1243_s22  }
 0x4d1   :  { %1221 = dma.done.wait [#allocation4], 16  }
 0x4d2   :  { %1222 = vsyncadd [#allocation4], 4294967280 }
 0x4d3   :  { %1223 = dma.done.wait [#allocation16], 256  }
 0x4d4   :  { %1224 = vsyncadd [#allocation16], 4294967040 }
 0x4d5   :  { %1225 = dma.done.wait [#allocation19], 256  }
 0x4d6   :  { %1226 = vsyncadd [#allocation19], 4294967040 }
 0x4d7   :  { %788 = vsyncpa [#allocation3], 1 }
 0x4d8   :  { %789 = vsyncpa [#allocation6], 1 }
 0x4d9   :  { %790 = vsyncpa [#allocation9], 1 }
 0x4da   :  { %791 = vsyncpa [#allocation12], 1 }
 0x4db   :  { %792 = vsyncpa [#allocation4], 1 }
 0x4dc   :  { %793 = vsyncpa [#allocation16], 1 }
 0x4dd   :  { %794 = vsyncpa [#allocation19], 1 }

</bundles_post_ra>
